<compile_context>
chip_gen: v7x
topology: tpu7x:2x2x1
jax: 0.10.0
libtpu: 0.0.40
codegen_flags: <defaults>
</compile_context>

<pallas_src>
import functools

import jax
import jax.numpy as jnp
from jax.experimental import pallas as pl
from jax.experimental.pallas import tpu as pltpu


def _round_up(x: int, m: int) -> int:
    return ((x + m - 1) // m) * m


# --------------------------------------------------------------------------- #
# Kernel
# --------------------------------------------------------------------------- #
def _ensemble_mlp_kernel(x_ref, *refs, layer_modes, layer_dims, K, dot_dtype):
    """One batch tile; ensemble members fused into the lane dimension.

    refs = (w_0, b_0, ..., w_{L-1}, b_{L-1}, out_ref)
      x_ref : (bt, input_dim)
      "fused" layer: w_l (in_fused, out_fused) bf16, b_l (1, out_fused) f32
      "split" layer: w_l (K, in_l, out_l)      bf16, b_l (1, K*out_l)   f32
      out   : (bt, out_lanes)  lane-dense (out_lanes = round_up(K*out, 128))
    """
    out_ref = refs[-1]
    params = refs[:-1]
    num_layers = len(layer_modes)

    h = x_ref[...].astype(jnp.float32)
    for layer, mode in enumerate(layer_modes):
        w = params[2 * layer]
        b = params[2 * layer + 1][...]
        if mode == "fused":
            h = jnp.dot(h.astype(dot_dtype), w[...],
                        preferred_element_type=jnp.float32) + b
        else:
            # Per-member dots (block-diag would waste ~K x MXU FLOPs here).
            in_d, _ = layer_dims[layer]
            parts = [
                jnp.dot(h[:, k * in_d:(k + 1) * in_d].astype(dot_dtype), w[k],
                        preferred_element_type=jnp.float32)
                for k in range(K)
            ]
            h = jnp.concatenate(parts, axis=-1) + b
        if layer < num_layers - 1:          # hidden layers: ReLU
            h = jnp.maximum(h, 0.0)

    # Lane-dense store: zero-fill up to the padded output width if the last
    # layer took the "split" path (the "fused" last layer is pre-padded).
    pad = out_ref.shape[-1] - h.shape[-1]
    if pad > 0:
        h = jnp.concatenate(
            [h, jnp.zeros((h.shape[0], pad), h.dtype)], axis=-1)
    out_ref[...] = h.astype(out_ref.dtype)


# --------------------------------------------------------------------------- #
# One-time parameter fusion (hoisted out of the per-call path)
# --------------------------------------------------------------------------- #
def prepare_fused_params(weights, biases, *, dot_dtype=jnp.bfloat16,
                         max_fused_width=256, lane_multiple=128):
    """Fuse the ensemble axis into the lane dimension ONCE per parameter set.

    weights[l]: [K, in_l, out_l], biases[l]: [K, out_l]
    Returns a dict consumed by ensemble_mlp_forward.
    """
    K = weights[0].shape[0]
    num_layers = len(weights)
    input_dim = weights[0].shape[1]
    output_dim = weights[-1].shape[-1]
    out_lanes = _round_up(K * output_dim, lane_multiple)

    fused_w, fused_b, modes, dims = [], [], [], []
    for l, (w, b) in enumerate(zip(weights, biases)):
        k_, in_d, out_d = w.shape
        dims.append((in_d, out_d))
        is_last = (l == num_layers - 1)
        if l == 0:
            # Shared (un-ensembled) input -> concatenate members along lanes:
            #   Wf0[i, k*out + o] = W0[k, i, o]
            wf = jnp.transpose(w, (1, 0, 2)).reshape(in_d, k_ * out_d)
            bf = b.reshape(1, k_ * out_d).astype(jnp.float32)
            mode = "fused"
        elif K * in_d <= max_fused_width and K * out_d <= max_fused_width:
            # Block-diagonal fused weight (exact; zeros are exact in bf16):
            #   Wbd[k*in + a, k*out + c] = W_l[k, a, c]
            eye = jnp.eye(k_, dtype=w.dtype)
            wf = jnp.einsum('kio,kl->kilo', w, eye).reshape(k_ * in_d,
                                                            k_ * out_d)
            bf = b.reshape(1, k_ * out_d).astype(jnp.float32)
            mode = "fused"
        else:
            # Too wide to block-diagonalize profitably: keep per-member
            # weights resident and do K separate dots in-kernel.
            wf = w
            bf = b.reshape(1, k_ * out_d).astype(jnp.float32)
            mode = "split"
        if is_last and mode == "fused" and wf.shape[-1] < out_lanes:
            pad = out_lanes - wf.shape[-1]
            wf = jnp.pad(wf, ((0, 0), (0, pad)))
            bf = jnp.pad(bf, ((0, 0), (0, pad)))
        fused_w.append(wf.astype(dot_dtype))
        fused_b.append(bf)
        modes.append(mode)

    return dict(weights=fused_w, biases=fused_b, modes=tuple(modes),
                dims=tuple(dims), K=K, input_dim=input_dim,
                output_dim=output_dim, out_lanes=out_lanes,
                dot_dtype=dot_dtype)


# --------------------------------------------------------------------------- #
# Forward wrapper
# --------------------------------------------------------------------------- #
def ensemble_mlp_forward(x, fused_params, *, batch_tile=None, out_dtype=None):
    """x: [batch, input_dim] -> [batch, ensemble_dim, output_dim]."""
    batch, input_dim = x.shape
    assert input_dim == fused_params["input_dim"], (input_dim,
                                                    fused_params["input_dim"])
    K = fused_params["K"]
    output_dim = fused_params["output_dim"]
    out_lanes = fused_params["out_lanes"]
    fw, fb = fused_params["weights"], fused_params["biases"]
    modes, dims = fused_params["modes"], fused_params["dims"]
    dot_dtype = fused_params["dot_dtype"]
    out_dtype = x.dtype if out_dtype is None else out_dtype

    # ---- batch tiling -------------------------------------------------------
    if batch_tile is None:
        # Rough per-row footprint: f32 activations at every fused width plus
        # double-buffered I/O tiles; sized against a 16 MiB slice so the tile
        # stays safe under v7x's 32 MiB scoped default (and v5e after we raise
        # the limit to 32 MiB below).
        lane_widths = [input_dim] + [K * d[1] for d in dims[:-1]] + [out_lanes]
        per_row = 4 * sum(lane_widths) + 2 * (input_dim + out_lanes)
        budget = 16 << 20
        batch_tile = max(8, min(2048, (budget // max(per_row, 1)) // 8 * 8))
    bt = min(_round_up(batch, 8), _round_up(batch_tile, 8))
    padded = _round_up(batch, bt)
    # v7x megacore: make sure there are >=2 grid steps so the "parallel" batch
    # axis shards across both TensorCores; costs one extra ~0.35us step on
    # 1-TC chips (v5e/v6e), which is negligible.
    if padded // bt < 2 and bt > 8:
        bt = max(8, _round_up(-(-bt // 2), 8))
        padded = _round_up(batch, bt)
    if padded != batch:
        x = jnp.pad(x, ((0, padded - batch), (0, 0)))

    # ---- pallas_call --------------------------------------------------------
    in_specs = [pl.BlockSpec((bt, input_dim), lambda i: (i, 0))]
    operands = [x]
    for w, b in zip(fw, fb):
        # Whole-array blocks with constant block index -> DMA'd once, kept
        # VMEM-resident across all batch tiles.
        if w.ndim == 2:
            in_specs.append(pl.BlockSpec(w.shape, lambda i: (0, 0)))
        else:
            in_specs.append(pl.BlockSpec(w.shape, lambda i: (0, 0, 0)))
        in_specs.append(pl.BlockSpec(b.shape, lambda i: (0, 0)))
        operands.append(w)
        operands.append(b)

    kernel = functools.partial(_ensemble_mlp_kernel, layer_modes=modes,
                               layer_dims=dims, K=K, dot_dtype=dot_dtype)

    out_flat = pl.pallas_call(
        kernel,
        out_shape=jax.ShapeDtypeStruct((padded, out_lanes), out_dtype),
        grid=(padded // bt,),
        in_specs=in_specs,
        out_specs=pl.BlockSpec((bt, out_lanes), lambda i: (i, 0)),
        compiler_params=pltpu.CompilerParams(
            dimension_semantics=("parallel",),
            vmem_limit_bytes=32 * 1024 * 1024),
    )(*operands)

    # Lane-dense (bt, 128) slab -> slice the valid K*out lanes and reshape
    # (a cheap reshape, not a transpose).
    return out_flat[:batch, :K * output_dim].reshape(batch, K, output_dim)


# --------------------------------------------------------------------------- #
# Init + pure-JAX reference
# --------------------------------------------------------------------------- #
def init_ensemble_mlp_params(key, input_dim, output_dim, ensemble_dim,
                             hidden_dims):
    """Matches EnsembleLinear.__init__: weight ~ trunc_normal(std=1/(2*sqrt(in))),
    bias = 0.  (Truncation bounds are in std units here vs absolute +-2 in
    torch's trunc_normal_; irrelevant to forward-pass correctness.)"""
    dims = [input_dim] + list(hidden_dims) + [output_dim]
    weights, biases = [], []
    for l in range(len(dims) - 1):
        key, sub = jax.random.split(key)
        in_d, out_d = dims[l], dims[l + 1]
        std = 1.0 / (2.0 * in_d ** 0.5)
        w = std * jax.random.truncated_normal(
            sub, -2.0, 2.0, (ensemble_dim, in_d, out_d), jnp.float32)
        b = jnp.zeros((ensemble_dim, out_d), jnp.float32)
        weights.append(w)
        biases.append(b)
    return weights, biases


def ensemble_mlp_reference(x, weights, biases, dot_dtype=jnp.float32):
    """Pure-JAX reference mirroring the PyTorch module.  dot_dtype lets the
    reference mirror the kernel's MXU precision (bf16 operands, f32 acc)."""
    K = weights[0].shape[0]
    h = jnp.broadcast_to(x[:, None, :], (x.shape[0], K, x.shape[1]))
    h = h.astype(jnp.float32)
    num_layers = len(weights)
    for l in range(num_layers):
        h = jnp.einsum('kio,bki->bko',
                       weights[l].astype(dot_dtype), h.astype(dot_dtype),
                       preferred_element_type=jnp.float32) + biases[l]
        if l < num_layers - 1:
            h = jnp.maximum(h, 0.0)
    return h


if __name__ == "__main__":
    batch = 8
    input_dim = 16
    output_dim = 8
    ensemble_dim = 4
    hidden_dims = [32, 32]

    key = jax.random.PRNGKey(0)
    key, kx = jax.random.split(key)
    x = jax.random.normal(kx, (batch, input_dim), jnp.float32)

    weights, biases = init_ensemble_mlp_params(
        key, input_dim, output_dim, ensemble_dim, hidden_dims)

    # Hoisted, once-per-parameter-set fusion (not part of the per-call path).
    fused = prepare_fused_params(weights, biases)
    fused = jax.tree_util.tree_map(
        lambda a: jax.block_until_ready(a) if isinstance(a, jax.Array) else a,
        fused)

    out = ensemble_mlp_forward(x, fused)
    out = jax.block_until_ready(out)
    assert out.shape == (batch, ensemble_dim, output_dim), out.shape

    # Tight check vs a reference using the same MXU precision policy
    # (bf16 operands, f32 accumulation).
    ref_mxu = ensemble_mlp_reference(x, weights, biases,
                                     dot_dtype=jnp.bfloat16)
    assert jnp.allclose(out, ref_mxu, atol=1e-4, rtol=1e-4), \
        float(jnp.max(jnp.abs(out - ref_mxu)))

    # Sanity check vs the full-f32 module semantics (bf16 quantization only).
    ref_f32 = ensemble_mlp_reference(x, weights, biases,
                                     dot_dtype=jnp.float32)
    assert jnp.allclose(out, ref_f32, atol=3e-2, rtol=3e-2), \
        float(jnp.max(jnp.abs(out - ref_f32)))

    print("KERNEL_OK")
</pallas_src>

<mosaic_0001>
module attributes {stable_mosaic.version = 11 : i64} {
  func.func @_ensemble_mlp_kernel(%arg0: i32, %arg1: memref<8x16xf32, #tpu.memory_space<vmem>>, %arg2: memref<16x128xbf16, #tpu.memory_space<vmem>>, %arg3: memref<1x128xf32, #tpu.memory_space<vmem>>, %arg4: memref<128x128xbf16, #tpu.memory_space<vmem>>, %arg5: memref<1x128xf32, #tpu.memory_space<vmem>>, %arg6: memref<128x128xbf16, #tpu.memory_space<vmem>>, %arg7: memref<1x128xf32, #tpu.memory_space<vmem>>, %arg8: memref<8x128xf32, #tpu.memory_space<vmem>>) attributes {dimension_semantics = [#tpu.dimension_semantics<parallel>], iteration_bounds = array<i64: 1>, scalar_prefetch = 0 : i64, scratch_operands = 0 : i64, tpu.core_type = #tpu.core_type<tc>, window_params = [{transform_indices = @transform_0, window_bounds = array<i64: 8, 16>}, {pipeline_mode = #tpu.pipeline_mode<synchronous>, transform_indices = @transform_1, window_bounds = array<i64: 16, 128>}, {pipeline_mode = #tpu.pipeline_mode<synchronous>, transform_indices = @transform_2, window_bounds = array<i64: 1, 128>}, {pipeline_mode = #tpu.pipeline_mode<synchronous>, transform_indices = @transform_3, window_bounds = array<i64: 128, 128>}, {pipeline_mode = #tpu.pipeline_mode<synchronous>, transform_indices = @transform_4, window_bounds = array<i64: 1, 128>}, {pipeline_mode = #tpu.pipeline_mode<synchronous>, transform_indices = @transform_5, window_bounds = array<i64: 128, 128>}, {pipeline_mode = #tpu.pipeline_mode<synchronous>, transform_indices = @transform_6, window_bounds = array<i64: 1, 128>}, {transform_indices = @transform_7, window_bounds = array<i64: 8, 128>}]} {
    %c0 = arith.constant 0 : index
    %c0_0 = arith.constant 0 : index
    %0 = vector.load %arg1[%c0, %c0_0] : memref<8x16xf32, #tpu.memory_space<vmem>>, vector<8x16xf32>
    %c0_1 = arith.constant 0 : index
    %c0_2 = arith.constant 0 : index
    %1 = vector.load %arg3[%c0_1, %c0_2] : memref<1x128xf32, #tpu.memory_space<vmem>>, vector<1x128xf32>
    %2 = arith.truncf %0 : vector<8x16xf32> to vector<8x16xbf16>
    %c0_3 = arith.constant 0 : index
    %c0_4 = arith.constant 0 : index
    %3 = vector.load %arg2[%c0_3, %c0_4] : memref<16x128xbf16, #tpu.memory_space<vmem>>, vector<16x128xbf16>
    %cst = arith.constant dense<0.000000e+00> : vector<8x128xf32>
    %4 = tpu.matmul %2, %3, %cst {dimension_numbers = #tpu.dot_dimension_numbers<[1], [0], [0], [1], [0, 0, 1, 1], [], []>} : vector<8x16xbf16>, vector<16x128xbf16>, vector<8x128xf32> -> vector<8x128xf32>
    %5 = vector.broadcast %1 : vector<1x128xf32> to vector<8x128xf32>
    %6 = arith.addf %4, %5 : vector<8x128xf32>
    %cst_5 = arith.constant 0.000000e+00 : f32
    %7 = vector.broadcast %cst_5 : f32 to vector<8x128xf32>
    %8 = arith.maximumf %6, %7 : vector<8x128xf32>
    %c0_6 = arith.constant 0 : index
    %c0_7 = arith.constant 0 : index
    %9 = vector.load %arg5[%c0_6, %c0_7] : memref<1x128xf32, #tpu.memory_space<vmem>>, vector<1x128xf32>
    %10 = arith.truncf %8 : vector<8x128xf32> to vector<8x128xbf16>
    %c0_8 = arith.constant 0 : index
    %c0_9 = arith.constant 0 : index
    %11 = vector.load %arg4[%c0_8, %c0_9] : memref<128x128xbf16, #tpu.memory_space<vmem>>, vector<128x128xbf16>
    %cst_10 = arith.constant dense<0.000000e+00> : vector<8x128xf32>
    %12 = tpu.matmul %10, %11, %cst_10 {dimension_numbers = #tpu.dot_dimension_numbers<[1], [0], [0], [1], [0, 0, 1, 1], [], []>} : vector<8x128xbf16>, vector<128x128xbf16>, vector<8x128xf32> -> vector<8x128xf32>
    %13 = vector.broadcast %9 : vector<1x128xf32> to vector<8x128xf32>
    %14 = arith.addf %12, %13 : vector<8x128xf32>
    %cst_11 = arith.constant 0.000000e+00 : f32
    %15 = vector.broadcast %cst_11 : f32 to vector<8x128xf32>
    %16 = arith.maximumf %14, %15 : vector<8x128xf32>
    %c0_12 = arith.constant 0 : index
    %c0_13 = arith.constant 0 : index
    %17 = vector.load %arg7[%c0_12, %c0_13] : memref<1x128xf32, #tpu.memory_space<vmem>>, vector<1x128xf32>
    %18 = arith.truncf %16 : vector<8x128xf32> to vector<8x128xbf16>
    %c0_14 = arith.constant 0 : index
    %c0_15 = arith.constant 0 : index
    %19 = vector.load %arg6[%c0_14, %c0_15] : memref<128x128xbf16, #tpu.memory_space<vmem>>, vector<128x128xbf16>
    %cst_16 = arith.constant dense<0.000000e+00> : vector<8x128xf32>
    %20 = tpu.matmul %18, %19, %cst_16 {dimension_numbers = #tpu.dot_dimension_numbers<[1], [0], [0], [1], [0, 0, 1, 1], [], []>} : vector<8x128xbf16>, vector<128x128xbf16>, vector<8x128xf32> -> vector<8x128xf32>
    %21 = vector.broadcast %17 : vector<1x128xf32> to vector<8x128xf32>
    %22 = arith.addf %20, %21 : vector<8x128xf32>
    %c0_17 = arith.constant 0 : index
    %c0_18 = arith.constant 0 : index
    %23 = vector.load %arg8[%c0_17, %c0_18] : memref<8x128xf32, #tpu.memory_space<vmem>>, vector<8x128xf32>
    tpu.vector_store %arg8[%c0_17, %c0_18], %22 {strides = array<i32>} : memref<8x128xf32, #tpu.memory_space<vmem>>, vector<8x128xf32>,
    return
  }
  func.func @transform_0(%arg0: i32) -> (i32, i32) {
    %c0_i32 = arith.constant 0 : i32
    %c0_i32_0 = arith.constant 0 : i32
    return %arg0, %c0_i32 : i32, i32
  }
  func.func @transform_1(%arg0: i32) -> (i32, i32) {
    %c0_i32 = arith.constant 0 : i32
    %c0_i32_0 = arith.constant 0 : i32
    %c0_i32_1 = arith.constant 0 : i32
    return %c0_i32, %c0_i32_0 : i32, i32
  }
  func.func @transform_2(%arg0: i32) -> (i32, i32) {
    %c0_i32 = arith.constant 0 : i32
    %c0_i32_0 = arith.constant 0 : i32
    %c0_i32_1 = arith.constant 0 : i32
    return %c0_i32, %c0_i32_0 : i32, i32
  }
  func.func @transform_3(%arg0: i32) -> (i32, i32) {
    %c0_i32 = arith.constant 0 : i32
    %c0_i32_0 = arith.constant 0 : i32
    %c0_i32_1 = arith.constant 0 : i32
    return %c0_i32, %c0_i32_0 : i32, i32
  }
  func.func @transform_4(%arg0: i32) -> (i32, i32) {
    %c0_i32 = arith.constant 0 : i32
    %c0_i32_0 = arith.constant 0 : i32
    %c0_i32_1 = arith.constant 0 : i32
    return %c0_i32, %c0_i32_0 : i32, i32
  }
  func.func @transform_5(%arg0: i32) -> (i32, i32) {
    %c0_i32 = arith.constant 0 : i32
    %c0_i32_0 = arith.constant 0 : i32
    %c0_i32_1 = arith.constant 0 : i32
    return %c0_i32, %c0_i32_0 : i32, i32
  }
  func.func @transform_6(%arg0: i32) -> (i32, i32) {
    %c0_i32 = arith.constant 0 : i32
    %c0_i32_0 = arith.constant 0 : i32
    %c0_i32_1 = arith.constant 0 : i32
    return %c0_i32, %c0_i32_0 : i32, i32
  }
  func.func @transform_7(%arg0: i32) -> (i32, i32) {
    %c0_i32 = arith.constant 0 : i32
    %c0_i32_0 = arith.constant 0 : i32
    return %arg0, %c0_i32 : i32, i32
  }
}

</mosaic_0001>

<bundles_post_ra>
// kernel: tpu_custom_call.1
= control target key start
LH: loop header
LB: loop body
LE: loop exit
PB: predicated region body
PF: predicated region fallthrough
CT: control target
= control target key end

     0   :  { %12 = vsyncpa [#allocation3], 0  ;;  %s764_s0 = inlined_call_operand.hbm [shape: f32[8,16], index: 0, kind: input, shape index: {}]   ;;  %s765_s1 = inlined_call_operand.hbm [shape: bf16[16,128], index: 1, kind: input, shape index: {}]   ;;  %s766_s2 = inlined_call_operand.vmem [shape: f32[1,128], index: 2, kind: input, shape index: {}]   ;;  %s767_s3 = inlined_call_operand.hbm [shape: bf16[128,128], index: 3, kind: input, shape index: {}]   ;;  %s768_s4 = inlined_call_operand.vmem [shape: f32[1,128], index: 4, kind: input, shape index: {}]   ;;  %s769_s5 = inlined_call_operand.hbm [shape: bf16[128,128], index: 5, kind: input, shape index: {}]   ;;  %s770_s6 = inlined_call_operand.vmem [shape: f32[1,128], index: 6, kind: input, shape index: {}]   ;;  %s771_s7 = inlined_call_operand.hbm [shape: f32[8,128], index: 7, kind: output, shape index: {}]  }
   0x1   :  { %13 = vsyncpa [#allocation6], 0 }
   0x2   :  { %14 = vsyncpa [#allocation9], 0 }
   0x3   :  { %15 = vsyncpa [#allocation4], 0  ;;  %s617_s24 = smov [#allocation5]   ;;  %s499_s28 = scalar_lea.hbm %s765_s1, 128 }
   0x4   :  { %s31_s25 = sshll.u32 %s617_s24, 4  ;;  %p500_p0 = scmp.ne.s32.totalorder %s765_s1, %s499_s28  ;;  %s32_s25 = int_to_ptr.vmem [resolvable:$true] %s31_s25 }
   0x5   :  { %p503_p1 = scmp.lt.u32.totalorder %s499_s28, %s765_s1 }
   0x7   :  { %p505_p2 = pnand %p503_p1, %p500_p0 }
   0x9   :  { %508 = shalt.err (!%p505_p2)
}
   0xa   :  { %s509_s10 = scalar_lea.vmem %s32_s25, 128  ;;  %p514_p4 = scmp.lt.s32.totalorder %s32_s25, %s32_s25 }
   0xb   :  { %p510_p3 = scmp.ne.s32.totalorder %s32_s25, %s509_s10  ;;  %p515_p5 = scmp.lt.s32.totalorder %s509_s10, %s509_s10 }
   0xd   :  { %p516_p6 = por %p515_p5, %p514_p4 }
   0xf   :  { %p517_p7 = pnand %p516_p6, %p510_p3 }
  0x11   :  { %520 = shalt.err (!%p517_p7)
}
  0x12   :  { %s618_s11 = smov 64   ;;  %s619_s12 = smov 4  }
  0x13   :  { %37 = dma.hbm_to_vmem [thread:$0]  %s765_s1, 128, %s32_s25, [#allocation6], %s618_s11, %s618_s11, %s619_s12  }
  0x14   :  { %s620_s15 = smov [#allocation2]   ;;  %s621_s17 = smov [#allocation7]  }
  0x15   :  { %s22_s16 = sshll.u32 %s620_s15, 4  ;;  %s45_s18 = sshll.u32 %s621_s17, 4  ;;  %s23_s16 = int_to_ptr.vmem [resolvable:$true] %s22_s16  ;;  %s46_s18 = int_to_ptr.vmem [resolvable:$true] %s45_s18 }
  0x16   :  { %s521_s21 = scalar_lea.hbm %s764_s0, 128 }
  0x17   :  { %p522_p8 = scmp.ne.s32.totalorder %s764_s0, %s521_s21  ;;  %p525_p9 = scmp.lt.u32.totalorder %s521_s21, %s764_s0 }
  0x19   :  { %p527_p10 = pnand %p525_p9, %p522_p8 }
  0x1b   :  { %530 = shalt.err (!%p527_p10)
}
  0x1c   :  { %s531_s1 = scalar_lea.vmem %s23_s16, 128  ;;  %p536_p12 = scmp.lt.s32.totalorder %s23_s16, %s23_s16 }
  0x1d   :  { %p532_p11 = scmp.ne.s32.totalorder %s23_s16, %s531_s1  ;;  %p537_p13 = scmp.lt.s32.totalorder %s531_s1, %s531_s1 }
  0x1f   :  { %p538_p0 = por %p537_p13, %p536_p12 }
  0x21   :  { %p539_p1 = pnand %p538_p0, %p532_p11 }
  0x23   :  { %542 = shalt.err (!%p539_p1)
}
  0x24   :  { %25 = dma.hbm_to_vmem [thread:$0]  %s764_s0, 128, %s23_s16, [#allocation3]  }
  0x25   :  { %s543_s30 = scalar_lea.hbm %s767_s3, 1024 }
  0x26   :  { %p544_p2 = scmp.ne.s32.totalorder %s767_s3, %s543_s30  ;;  %p547_p3 = scmp.lt.u32.totalorder %s543_s30, %s767_s3 }
  0x28   :  { %p549_p4 = pnand %p547_p3, %p544_p2 }
  0x2a   :  { %552 = shalt.err (!%p549_p4)
}
  0x2b   :  { %s553_s14 = scalar_lea.vmem %s46_s18, 1024  ;;  %p558_p6 = scmp.lt.s32.totalorder %s46_s18, %s46_s18 }
  0x2c   :  { %p554_p5 = scmp.ne.s32.totalorder %s46_s18, %s553_s14  ;;  %p559_p7 = scmp.lt.s32.totalorder %s553_s14, %s553_s14 }
  0x2e   :  { %p560_p8 = por %p559_p7, %p558_p6 }
  0x30   :  { %p561_p9 = pnand %p560_p8, %p554_p5 }
  0x32   :  { %564 = shalt.err (!%p561_p9)
}
  0x33   :  { %51 = dma.hbm_to_vmem [thread:$0]  %s767_s3, 1024, %s46_s18, [#allocation6], %s618_s11, %s618_s11, %s619_s12  }
  0x34   :  { %s622_s16 = smov [#allocation8]   ;;  %s565_s21 = scalar_lea.hbm %s769_s5, 1024 }
  0x35   :  { %s59_s17 = sshll.u32 %s622_s16, 4  ;;  %p566_p10 = scmp.ne.s32.totalorder %s769_s5, %s565_s21  ;;  %s60_s17 = int_to_ptr.vmem [resolvable:$true] %s59_s17 }
  0x36   :  { %p569_p11 = scmp.lt.u32.totalorder %s565_s21, %s769_s5 }
  0x38   :  { %p571_p12 = pnand %p569_p11, %p566_p10 }
  0x3a   :  { %574 = shalt.err (!%p571_p12)
}
  0x3b   :  { %s575_s1 = scalar_lea.vmem %s60_s17, 1024  ;;  %p580_p0 = scmp.lt.s32.totalorder %s60_s17, %s60_s17 }
  0x3c   :  { %p576_p13 = scmp.ne.s32.totalorder %s60_s17, %s575_s1  ;;  %p581_p1 = scmp.lt.s32.totalorder %s575_s1, %s575_s1 }
  0x3e   :  { %p582_p2 = por %p581_p1, %p580_p0 }
  0x40   :  { %p583_p3 = pnand %p582_p2, %p576_p13 }
  0x42   :  { %586 = shalt.err (!%p583_p3)
}
  0x43   :  { %65 = dma.hbm_to_vmem [thread:$0]  %s769_s5, 1024, %s60_s17, [#allocation9], %s618_s11, %s618_s11, %s619_s12  }
  0x44   :  { %609 = dma.done.wait [#allocation3], 128  }
  0x45   :  { %610 = vsyncadd [#allocation3], 4294967168 }
  0x46   :  { %611 = dma.done.wait [#allocation6], 1152  }
  0x47   :  { %612 = vsyncadd [#allocation6], 4294966144 }
  0x48   :  { %613 = dma.done.wait [#allocation9], 1024  }
  0x49   :  { %614 = vsyncadd [#allocation9], 4294966272  ;;  %v623_v0 = vmov 0.0   ;;  %vm624_vm0 = vmmov 0   ;;  %v482_v1 = vld [vmem:[#allocation5] sm:$0xff]   ;;  %v81_v2 = vld [vmem:[#allocation2] sm:$0xff] }
  0x4a   :  { %427 = vmatprep.subr.bf16.mxu0 %v623_v0  ;;  %429 = vmatprep.mubr.msk.bf16.mxu0 %vm624_vm0, %v623_v0  ;;  %v83_v3 = vpack.c.bf16 %v81_v2, %v81_v2  ;;  %vm98_vm1 = vcmask 130048   ;;  %v483_v4 = vld [vmem:[#allocation7] sm:$0xff]   ;;  %v484_v5 = vld [vmem:[#allocation7 + $0x8] sm:$0xff]   ;;  %v485_v6 = vld [vmem:[#allocation7 + $0x10] sm:$0xff]   ;;  %s625_s28 = smov [#allocation10]  }
  0x4b   :  { %433 = vmatprep.subr.bf16.mxu1 %v623_v0  ;;  %449 = vmatprep.mubr.msk.bf16.mxu1 %vm624_vm0, %v623_v0  ;;  %v486_v7 = vld [vmem:[#allocation7 + $0x18] sm:$0xff]   ;;  %v487_v8 = vld [vmem:[#allocation7 + $0x20] sm:$0xff]   ;;  %v488_v9 = vld [vmem:[#allocation7 + $0x28] sm:$0xff]   ;;  %s375_s29 = sshll.u32 %s625_s28, 4  ;;  %s376_s29 = int_to_ptr.vmem [resolvable:$true] %s375_s29 }
  0x4c   :  { %428 = vmatpush3.bf16.msra.mxu0 %v482_v1  ;;  %434 = vmatpush3.bf16.msra.mxu1 %v483_v4  ;;  %v489_v10 = vld [vmem:[#allocation7 + $0x30] sm:$0xff]   ;;  %v490_v11 = vld [vmem:[#allocation7 + $0x38] sm:$0xff]   ;;  %v491_v12 = vld [vmem:[#allocation8] sm:$0xff]   ;;  %p592_p5 = scmp.lt.s32.totalorder %s376_s29, %s376_s29 }
  0x4d   :  { %453 = vmatprep.subr.bf16.mxu0 %v623_v0  ;;  %435 = vmatprep.subr.bf16.mxu1 %v623_v0  ;;  %v492_v13 = vld [vmem:[#allocation8 + $0x8] sm:$0xff]   ;;  %v493_v14 = vld [vmem:[#allocation8 + $0x10] sm:$0xff]   ;;  %v494_v15 = vld [vmem:[#allocation8 + $0x18] sm:$0xff]  }
  0x4e   :  { %v495_v16 = vld [vmem:[#allocation8 + $0x20] sm:$0xff]   ;;  %v496_v17 = vld [vmem:[#allocation8 + $0x28] sm:$0xff]   ;;  %v386_v18 = vld [vmem:[%s766_s2] ss:$0 sm:$0xff] }
  0x4f   :  { %430 = vmatmul.mubr.msk.bf16.vlgmr.msra.gmra.mrb[0].mxu0 %vm98_vm1, %v83_v3  ;;  %v497_v26 = vld [vmem:[#allocation8 + $0x30] sm:$0xff]   ;;  %v498_v27 = vld [vmem:[#allocation8 + $0x38] sm:$0xff]  }
  0x50   :  { %469 = vmatprep.mubr.msk.bf16.mxu0 %vm624_vm0, %v623_v0  ;;  %436 = vmatpush3.bf16.msra.mxu1 %v484_v5  ;;  %v389_v28 = vld [vmem:[%s768_s4] ss:$0 sm:$0xff]  ;;  %s587_s4 = scalar_lea.vmem %s376_s29, 128 }
  0x51   :  { %437 = vmatprep.subr.bf16.mxu1 %v623_v0  ;;  %454 = vmatpush3.bf16.msra.mxu0 %v491_v12  ;;  %v398_v36 = vld [vmem:[%s770_s6] ss:$0 sm:$0xff]  ;;  %p588_p4 = scmp.ne.s32.totalorder %s376_s29, %s587_s4  ;;  %p593_p6 = scmp.lt.s32.totalorder %s587_s4, %s587_s4 }
  0x52   :  { %455 = vmatprep.subr.bf16.mxu0 %v623_v0 }
  0x53   :  { %p594_p7 = por %p593_p6, %p592_p5 }
  0x54   :  { %438 = vmatpush3.bf16.msra.mxu1 %v485_v6 }
  0x55   :  { %439 = vmatprep.subr.bf16.mxu1 %v623_v0  ;;  %456 = vmatpush3.bf16.msra.mxu0 %v492_v13  ;;  %p595_p8 = pnand %p594_p7, %p588_p4 }
  0x56   :  { %457 = vmatprep.subr.bf16.mxu0 %v623_v0 }
  0x58   :  { %440 = vmatpush3.bf16.msra.mxu1 %v486_v7 }
  0x59   :  { %441 = vmatprep.subr.bf16.mxu1 %v623_v0  ;;  %458 = vmatpush3.bf16.msra.mxu0 %v493_v14 }
  0x5a   :  { %459 = vmatprep.subr.bf16.mxu0 %v623_v0 }
  0x5c   :  { %442 = vmatpush3.bf16.msra.mxu1 %v487_v8 }
  0x5d   :  { %443 = vmatprep.subr.bf16.mxu1 %v623_v0  ;;  %460 = vmatpush3.bf16.msra.mxu0 %v494_v15 }
  0x5e   :  { %461 = vmatprep.subr.bf16.mxu0 %v623_v0 }
  0x60   :  { %444 = vmatpush3.bf16.msra.mxu1 %v488_v9 }
  0x61   :  { %445 = vmatprep.subr.bf16.mxu1 %v623_v0  ;;  %462 = vmatpush3.bf16.msra.mxu0 %v495_v16 }
  0x62   :  { %463 = vmatprep.subr.bf16.mxu0 %v623_v0 }
  0x64   :  { %446 = vmatpush3.bf16.msra.mxu1 %v489_v10 }
  0x65   :  { %447 = vmatprep.subr.bf16.mxu1 %v623_v0  ;;  %464 = vmatpush3.bf16.msra.mxu0 %v496_v17 }
  0x66   :  { %465 = vmatprep.subr.bf16.mxu0 %v623_v0 }
  0x68   :  { %448 = vmatpush3.bf16.msra.mxu1 %v490_v11 }
  0x69   :  { %466 = vmatpush3.bf16.msra.mxu0 %v497_v26 }
  0x6a   :  { %467 = vmatprep.subr.bf16.mxu0 %v623_v0 }
  0x6d   :  { %468 = vmatpush3.bf16.msra.mxu0 %v498_v27 }
 0x122   :  { %v136_v19 = vpop.f32.mrb[0].mxu0 }
 0x123   :  { %v137_v20 = vadd.f32 %v386_v18, %v136_v19  ;;  %v431_v21 = vpop.f32.mrb[1].mxu0 }
 0x124   :  { %v139_v22 = vpop.f32.mrb[2].mxu0 }
 0x125   :  { %v142_v23 = vmax.f32 %v137_v20, 0.0  ;;  %v432_v24 = vpop.f32.mrb[3].mxu0 }
 0x127   :  { %v144_v25 = vpack.c.bf16 %v142_v23, %v142_v23 }
 0x129   :  { %450 = vmatmul.mubr.bf16.vlgmr.msra.gmra.mrb[0].mxu1 %v144_v25 }
 0x1fc   :  { %v249_v29 = vpop.f32.mrb[0].mxu1 }
 0x1fd   :  { %v250_v30 = vadd.f32 %v389_v28, %v249_v29  ;;  %v451_v31 = vpop.f32.mrb[1].mxu1 }
 0x1fe   :  { %v252_v32 = vpop.f32.mrb[2].mxu1 }
 0x1ff   :  { %v255_v33 = vmax.f32 %v250_v30, 0.0  ;;  %v452_v34 = vpop.f32.mrb[3].mxu1 }
 0x201   :  { %v257_v35 = vpack.c.bf16 %v255_v33, %v255_v33 }
 0x203   :  { %470 = vmatmul.mubr.bf16.vlgmr.msra.gmra.mrb[4].mxu0 %v257_v35 }
 0x2d6   :  { %v362_v37 = vpop.f32.mrb[4].mxu0 }
 0x2d7   :  { %v363_v38 = vadd.f32 %v398_v36, %v362_v37  ;;  %v471_v39 = vpop.f32.mrb[5].mxu0 }
 0x2d8   :  { %v365_v40 = vpop.f32.mrb[6].mxu0 }
 0x2d9   :  { %368 = vst [vmem:[#allocation10] sm:$0xff] %v363_v38  ;;  %v472_v41 = vpop.f32.mrb[7].mxu0 }
 0x2da   :  { %598 = shalt.err (!%p595_p8)
}
 0x2db   :  { %s599_s6 = scalar_lea.hbm %s771_s7, 128 }
 0x2dc   :  { %p600_p9 = scmp.ne.s32.totalorder %s771_s7, %s599_s6  ;;  %p603_p10 = scmp.lt.u32.totalorder %s599_s6, %s771_s7 }
 0x2de   :  { %p605_p11 = pnand %p603_p10, %p600_p9 }
 0x2e0   :  { %608 = shalt.err (!%p605_p11)
}
 0x2e1   :  { %378 = dma.vmem_to_hbm [thread:$0]  %s376_s29, 128, %s771_s7, [#allocation4]  }
 0x2e2   :  { %615 = dma.done.wait [#allocation4], 128  }
 0x2e3   :  { %616 = vsyncadd [#allocation4], 4294967168 }
 0x2e4   :  { %382 = vsyncpa [#allocation3], 1 }
 0x2e5   :  { %383 = vsyncpa [#allocation6], 1 }
 0x2e6   :  { %384 = vsyncpa [#allocation9], 1 }
 0x2e7   :  { %385 = vsyncpa [#allocation4], 1 }

</bundles_post_ra>
